<compile_context>
chip_gen: v7x
topology: tpu7x:2x2x1
jax: 0.10.0
libtpu: 0.0.40
codegen_flags: <defaults>
</compile_context>

<pallas_src>
import jax
import jax.numpy as jnp
from jax.experimental import pallas as pl
from jax.experimental.pallas import tpu as pltpu


def _conv_block_kernel(p_ref, w_ref, b_ref, o_ref):
    # p_ref: (Kp, TM)  bf16 im2col patches (row index = (dy*7+dx)*C + c, zero-padded)
    # w_ref: (D, Kp)   bf16 merged (zero-padded-to-7x7, transposed) weights
    # b_ref: (D, 1)    f32 merged bias
    # o_ref: (D, TM)   f32 output tile, lane-dense (TM multiple of 128) store
    acc = jnp.dot(w_ref[...], p_ref[...],
                  preferred_element_type=jnp.float32)       # one MXU matmul, f32 acc
    o_ref[...] = (acc + b_ref[...]).astype(o_ref.dtype)     # f32 bias + store


def _round_up(v, m):
    return -(-v // m) * m


@jax.jit
def conv_block_pallas(x_nhwc, params):
    """params = [(w1,b1),(w2,b2),(w3,b3),(w4,b4)], wK in HWIO (k,k,C,d), bK (d,).

    Returns NCHW output (N, 4d, H, W), matching torch.cat([...], dim=1).
    """
    (w1, b1), (w2, b2), (w3, b3), (w4, b4) = params
    N, H, W, C = x_nhwc.shape
    d = w1.shape[-1]
    D = 4 * d
    K = 7 * 7 * C
    M = N * H * W                                            # batch fused into M

    # --- merge the 4 branches: center-pad each kernel to 7x7, concat on C_out.
    ws = []
    for w, k in zip((w1, w2, w3, w4), (1, 3, 5, 7)):
        p = (7 - k) // 2
        ws.append(jnp.pad(w, ((p, p), (p, p), (0, 0), (0, 0))))
    w_merged = jnp.concatenate(ws, axis=-1)                  # (7, 7, C, 4d)
    w_t = w_merged.reshape(K, D).T.astype(jnp.bfloat16)      # (D, K); K = (dy*7+dx)*C + c
    b_merged = jnp.concatenate((b1, b2, b3, b4)).reshape(D, 1).astype(jnp.float32)

    # --- im2col in plain JAX, bf16, transpose applied to the 1x input (not the
    #     49x-expanded patch tensor): NHWC -> (C,N,H,W) -> spatial pad -> 49 taps.
    x_c = x_nhwc.astype(jnp.bfloat16).transpose(3, 0, 1, 2)  # (C, N, H, W)
    x_pad = jnp.pad(x_c, ((0, 0), (0, 0), (3, 3), (3, 3)))   # (C, N, H+6, W+6)
    taps = [x_pad[:, :, dy:dy + H, dx:dx + W]                # each (C, N, H, W)
            for dy in range(7) for dx in range(7)]
    patches = jnp.stack(taps, axis=0).reshape(K, M)          # (K, N*H*W), bf16

    # --- alignment: K -> multiple of 16 (bf16 sublane group); fused M -> TM tiles.
    Kp = _round_up(K, 16)
    MAX_TM = 2048                                            # multiple of 128; VMEM-safe
    TM = min(_round_up(M, 128), MAX_TM)
    Mp = _round_up(M, TM)
    patches = jnp.pad(patches, ((0, Kp - K), (0, Mp - M)))   # zero rows/cols: exact
    w_t = jnp.pad(w_t, ((0, 0), (0, Kp - K)))

    # NOTE: for much larger H*W / C, build the patch tile inside the kernel from a
    # VMEM-resident padded input (49 copies) to kill the 49x HBM read amplification.
    out = pl.pallas_call(
        _conv_block_kernel,
        out_shape=jax.ShapeDtypeStruct((D, Mp), x_nhwc.dtype),
        grid=(Mp // TM,),                                    # = (1,) at the toy shape
        in_specs=[
            pl.BlockSpec((Kp, TM), lambda j: (0, j)),        # patch tile
            pl.BlockSpec((D, Kp), lambda j: (0, 0)),         # shared weights
            pl.BlockSpec((D, 1), lambda j: (0, 0)),          # shared bias
        ],
        out_specs=pl.BlockSpec((D, TM), lambda j: (0, j)),
        compiler_params=pltpu.CompilerParams(
            dimension_semantics=("parallel",)),              # shards tiles across TCs (v7x)
    )(patches, w_t, b_merged)

    out = out[:, :M].reshape(D, N, H, W)                     # tiny output relayout
    return out.transpose(1, 0, 2, 3)                         # NCHW (N, 4d, H, W)


def init_params(key, in_channels, out_channels):
    """Deterministic init mimicking nn.Conv2d's default U(-1/sqrt(fan_in), ...)."""
    d = out_channels // 4
    params = []
    for k in (1, 3, 5, 7):
        key, kw, kb = jax.random.split(key, 3)
        fan_in = in_channels * k * k
        bound = 1.0 / float(jnp.sqrt(fan_in))
        w = jax.random.uniform(kw, (k, k, in_channels, d), jnp.float32,
                               -bound, bound)
        b = jax.random.uniform(kb, (d,), jnp.float32, -bound, bound)
        params.append((w, b))
    return params


def conv_block_reference(x_nhwc, params, operand_dtype=jnp.float32):
    """Pure-JAX reference (XLA conv, f32 accumulation, selectable operand dtype)."""
    x = x_nhwc.astype(operand_dtype)
    outs = []
    for (w, b), k in zip(params, (1, 3, 5, 7)):
        p = (k - 1) // 2
        o = jax.lax.conv_general_dilated(
            x, w.astype(operand_dtype), window_strides=(1, 1),
            padding=((p, p), (p, p)),
            dimension_numbers=('NHWC', 'HWIO', 'NHWC'),
            preferred_element_type=jnp.float32)
        outs.append(o + b)
    return jnp.concatenate(outs, axis=-1)                    # NHWC


if __name__ == "__main__":
    key = jax.random.PRNGKey(0)
    k_x, k_p = jax.random.split(key)

    # Shapes consistent with the module: batch=2, input_channels=4,
    # output_channels=32 (d=8 per branch), spatial 16x16.  PyTorch input is NCHW.
    N, C_in, H, W = 2, 4, 16, 16
    C_out = 32

    x_nchw = jax.random.normal(k_x, (N, C_in, H, W), jnp.float32)
    x_nhwc = jnp.transpose(x_nchw, (0, 2, 3, 1))             # NCHW -> NHWC boundary

    params = init_params(k_p, C_in, C_out)

    out_nchw = jax.block_until_ready(conv_block_pallas(x_nhwc, params))
    assert out_nchw.shape == (N, C_out, H, W), out_nchw.shape

    # Primary check: reference with the same bf16 operand rounding (f32 accumulate).
    ref_bf16 = jnp.transpose(
        conv_block_reference(x_nhwc, params, jnp.bfloat16), (0, 3, 1, 2))
    ref_bf16 = jax.block_until_ready(ref_bf16)
    assert jnp.allclose(out_nchw, ref_bf16, atol=2e-3, rtol=2e-3), \
        float(jnp.max(jnp.abs(out_nchw - ref_bf16)))

    # Sanity check: full-precision reference, tolerance loosened for bf16 operands.
    ref_f32 = jnp.transpose(
        conv_block_reference(x_nhwc, params, jnp.float32), (0, 3, 1, 2))
    ref_f32 = jax.block_until_ready(ref_f32)
    assert jnp.allclose(out_nchw, ref_f32, atol=5e-2, rtol=5e-2), \
        float(jnp.max(jnp.abs(out_nchw - ref_f32)))

    print("KERNEL_OK")
</pallas_src>

<mosaic_0001>
module attributes {stable_mosaic.version = 11 : i64} {
  func.func @_conv_block_kernel(%arg0: i32, %arg1: memref<208x512xbf16, #tpu.memory_space<vmem>>, %arg2: memref<32x208xbf16, #tpu.memory_space<vmem>>, %arg3: memref<32x1xf32, #tpu.memory_space<vmem>>, %arg4: memref<32x512xf32, #tpu.memory_space<vmem>>) attributes {dimension_semantics = [#tpu.dimension_semantics<parallel>], iteration_bounds = array<i64: 1>, scalar_prefetch = 0 : i64, scratch_operands = 0 : i64, tpu.core_type = #tpu.core_type<tc>, window_params = [{transform_indices = @transform_0, window_bounds = array<i64: 208, 512>}, {pipeline_mode = #tpu.pipeline_mode<synchronous>, transform_indices = @transform_1, window_bounds = array<i64: 32, 208>}, {pipeline_mode = #tpu.pipeline_mode<synchronous>, transform_indices = @transform_2, window_bounds = array<i64: 32, 1>}, {transform_indices = @transform_3, window_bounds = array<i64: 32, 512>}]} {
    %c0 = arith.constant 0 : index
    %c0_0 = arith.constant 0 : index
    %0 = vector.load %arg2[%c0, %c0_0] : memref<32x208xbf16, #tpu.memory_space<vmem>>, vector<32x208xbf16>
    %c0_1 = arith.constant 0 : index
    %c0_2 = arith.constant 0 : index
    %1 = vector.load %arg1[%c0_1, %c0_2] : memref<208x512xbf16, #tpu.memory_space<vmem>>, vector<208x512xbf16>
    %cst = arith.constant dense<0.000000e+00> : vector<32x512xf32>
    %2 = tpu.matmul %0, %1, %cst {dimension_numbers = #tpu.dot_dimension_numbers<[1], [0], [0], [1], [0, 0, 1, 1], [], []>} : vector<32x208xbf16>, vector<208x512xbf16>, vector<32x512xf32> -> vector<32x512xf32>
    %c0_3 = arith.constant 0 : index
    %c0_4 = arith.constant 0 : index
    %3 = vector.load %arg3[%c0_3, %c0_4] : memref<32x1xf32, #tpu.memory_space<vmem>>, vector<32x1xf32>
    %4 = vector.broadcast %3 : vector<32x1xf32> to vector<32x512xf32>
    %5 = arith.addf %2, %4 : vector<32x512xf32>
    %c0_5 = arith.constant 0 : index
    %c0_6 = arith.constant 0 : index
    %6 = vector.load %arg4[%c0_5, %c0_6] : memref<32x512xf32, #tpu.memory_space<vmem>>, vector<32x512xf32>
    tpu.vector_store %arg4[%c0_5, %c0_6], %5 {strides = array<i32>} : memref<32x512xf32, #tpu.memory_space<vmem>>, vector<32x512xf32>,
    return
  }
  func.func @transform_0(%arg0: i32) -> (i32, i32) {
    %c0_i32 = arith.constant 0 : i32
    %c0_i32_0 = arith.constant 0 : i32
    return %c0_i32, %arg0 : i32, i32
  }
  func.func @transform_1(%arg0: i32) -> (i32, i32) {
    %c0_i32 = arith.constant 0 : i32
    %c0_i32_0 = arith.constant 0 : i32
    %c0_i32_1 = arith.constant 0 : i32
    return %c0_i32, %c0_i32_0 : i32, i32
  }
  func.func @transform_2(%arg0: i32) -> (i32, i32) {
    %c0_i32 = arith.constant 0 : i32
    %c0_i32_0 = arith.constant 0 : i32
    %c0_i32_1 = arith.constant 0 : i32
    return %c0_i32, %c0_i32_0 : i32, i32
  }
  func.func @transform_3(%arg0: i32) -> (i32, i32) {
    %c0_i32 = arith.constant 0 : i32
    %c0_i32_0 = arith.constant 0 : i32
    return %c0_i32, %arg0 : i32, i32
  }
}

</mosaic_0001>

<bundles_post_ra>
// kernel: conv_block_pallas.1
= control target key start
LH: loop header
LB: loop body
LE: loop exit
PB: predicated region body
PF: predicated region fallthrough
CT: control target
= control target key end

     0   :  { %v653_v1 = vmov 0   ;;  %vm373_vm0 = vcmask 654336   ;;  %s906_s0 = inlined_call_operand.vmem [shape: bf16[208,512], index: 0, kind: input, shape index: {}]   ;;  %s907_s1 = inlined_call_operand.vmem [shape: bf16[32,208], index: 1, kind: input, shape index: {}]   ;;  %s908_s2 = inlined_call_operand.vmem [shape: f32[32,1], index: 2, kind: input, shape index: {}]   ;;  %s909_s3 = inlined_call_operand.vmem [shape: f32[32,512], index: 3, kind: output, shape index: {}]  }
   0x1   :  { %v569_v0 = vld [vmem:[%s906_s0 + $0x4] ss:$16 sps:$4 sm:$0xff]   ;;  %567 = vset.pattern.permute.xlu0 %v653_v1  ;;  %568 = vset.pattern.permute.xlu1 %v653_v1  ;;  %v571_v2 = vld [vmem:[%s906_s0 + $0xc] ss:$16 sps:$4 sm:$0xff]   ;;  %v573_v3 = vld [vmem:[%s906_s0] ss:$16 sps:$4 sm:$0xff]  }
   0x2   :  { %380 = vmatprep.subr.bf16.mxu0 %v569_v0  ;;  %v574_v4 = vld [vmem:[%s906_s0 + $0x8] ss:$16 sps:$4 sm:$0xff]   ;;  %433 = vmatprep.subr.bf16.mxu1 %v571_v2  ;;  %v575_v5 = vld [vmem:[%s906_s0 + $0x24] ss:$16 sps:$4 sm:$0xff]   ;;  %v577_v6 = vld [vmem:[%s906_s0 + $0x2c] ss:$16 sps:$4 sm:$0xff]  }
   0x3   :  { %381 = vmatpush1.bf16.msra.mxu0 %v573_v3  ;;  %434 = vmatpush1.bf16.msra.mxu1 %v574_v4  ;;  %v579_v7 = vld [vmem:[%s906_s0 + $0x20] ss:$16 sps:$4 sm:$0xff]   ;;  %v580_v8 = vld [vmem:[%s906_s0 + $0x28] ss:$16 sps:$4 sm:$0xff]   ;;  %v581_v9 = vld [vmem:[%s906_s0 + $0x44] ss:$16 sps:$4 sm:$0xff]  }
   0x4   :  { %382 = vmatprep.subr.bf16.mxu0 %v575_v5  ;;  %435 = vmatprep.subr.bf16.mxu1 %v577_v6  ;;  %v583_v10 = vld [vmem:[%s906_s0 + $0x4c] ss:$16 sps:$4 sm:$0xff]   ;;  %v585_v11 = vld [vmem:[%s906_s0 + $0x40] ss:$16 sps:$4 sm:$0xff]   ;;  %v586_v12 = vld [vmem:[%s906_s0 + $0x48] ss:$16 sps:$4 sm:$0xff]  }
   0x5   :  { %v587_v13 = vld [vmem:[%s906_s0 + $0x64] ss:$16 sps:$4 sm:$0xff]   ;;  %v589_v14 = vld [vmem:[%s906_s0 + $0x6c] ss:$16 sps:$4 sm:$0xff]   ;;  %v591_v15 = vld [vmem:[%s906_s0 + $0x60] ss:$16 sps:$4 sm:$0xff]  }
   0x6   :  { %v592_v16 = vld [vmem:[%s906_s0 + $0x68] ss:$16 sps:$4 sm:$0xff]   ;;  %v593_v17 = vld [vmem:[%s906_s0 + $0x84] ss:$16 sps:$4 sm:$0xff]   ;;  %v595_v18 = vld [vmem:[%s906_s0 + $0x8c] ss:$16 sps:$4 sm:$0xff]  }
   0x7   :  { %383 = vmatpush1.bf16.msra.mxu0 %v579_v7  ;;  %436 = vmatpush1.bf16.msra.mxu1 %v580_v8  ;;  %v597_v19 = vld [vmem:[%s906_s0 + $0x80] ss:$16 sps:$4 sm:$0xff]   ;;  %v598_v20 = vld [vmem:[%s906_s0 + $0x88] ss:$16 sps:$4 sm:$0xff]   ;;  %v599_v21 = vld [vmem:[%s906_s0 + $0xa4] ss:$16 sps:$4 sm:$0xff]  }
   0x8   :  { %384 = vmatprep.subr.bf16.mxu0 %v581_v9  ;;  %437 = vmatprep.subr.bf16.mxu1 %v583_v10  ;;  %v601_v22 = vld [vmem:[%s906_s0 + $0xac] ss:$16 sps:$4 sm:$0xff]   ;;  %v603_v23 = vld [vmem:[%s906_s0 + $0xa0] ss:$16 sps:$4 sm:$0xff]   ;;  %v604_v24 = vld [vmem:[%s906_s0 + $0xa8] ss:$16 sps:$4 sm:$0xff]  }
   0x9   :  { %v605_v25 = vld [vmem:[%s906_s0 + $0xc4] ss:$16 sps:$4 sm:$0xff]   ;;  %v607_v26 = vld [vmem:[%s906_s0 + $0xcc] ss:$16 sps:$4 sm:$0xff]   ;;  %v609_v27 = vld [vmem:[%s906_s0 + $0xc0] ss:$16 sps:$4 sm:$0xff]  }
   0xa   :  { %v610_v28 = vld [vmem:[%s906_s0 + $0xc8] ss:$16 sps:$4 sm:$0xff]   ;;  %v611_v29 = vld [vmem:[%s906_s0 + $0xe4] ss:$16 sps:$4 sm:$0xff]   ;;  %v613_v30 = vld [vmem:[%s906_s0 + $0xec] ss:$16 sps:$4 sm:$0xff]  }
   0xb   :  { %385 = vmatpush1.bf16.msra.mxu0 %v585_v11  ;;  %438 = vmatpush1.bf16.msra.mxu1 %v586_v12  ;;  %v615_v31 = vld [vmem:[%s906_s0 + $0xe0] ss:$16 sps:$4 sm:$0xff]   ;;  %v616_v32 = vld [vmem:[%s906_s0 + $0xe8] ss:$16 sps:$4 sm:$0xff]   ;;  %v617_v33 = vld [vmem:[%s906_s0 + $0x104] ss:$16 sps:$4 sm:$0xff]  }
   0xc   :  { %386 = vmatprep.subr.bf16.mxu0 %v587_v13  ;;  %439 = vmatprep.subr.bf16.mxu1 %v589_v14  ;;  %v619_v34 = vld [vmem:[%s906_s0 + $0x10c] ss:$16 sps:$4 sm:$0xff]   ;;  %v621_v35 = vld [vmem:[%s906_s0 + $0x100] ss:$16 sps:$4 sm:$0xff]   ;;  %v622_v36 = vld [vmem:[%s906_s0 + $0x108] ss:$16 sps:$4 sm:$0xff]  }
   0xd   :  { %v623_v37 = vld [vmem:[%s906_s0 + $0x124] ss:$16 sps:$4 sm:$0xff]   ;;  %v625_v38 = vld [vmem:[%s906_s0 + $0x12c] ss:$16 sps:$4 sm:$0xff]   ;;  %v627_v39 = vld [vmem:[%s906_s0 + $0x120] ss:$16 sps:$4 sm:$0xff]  }
   0xe   :  { %v649_v40 = vld [vmem:[%s907_s1 + $0x4] ss:$8 sps:$4 sm:$0xff]   ;;  %v628_v41 = vld [vmem:[%s906_s0 + $0x128] ss:$16 sps:$4 sm:$0xff]   ;;  %v73_v45 = vld [vmem:[%s908_s2 + $0x10] sm:$0xff] }
   0xf   :  { %387 = vmatpush1.bf16.msra.mxu0 %v591_v15  ;;  %440 = vmatpush1.bf16.msra.mxu1 %v592_v16  ;;  %v629_v42 = vld [vmem:[%s906_s0 + $0x144] ss:$16 sps:$4 sm:$0xff]   ;;  %v631_v43 = vld [vmem:[%s906_s0 + $0x14c] ss:$16 sps:$4 sm:$0xff]   ;;  %v633_v46 = vld [vmem:[%s906_s0 + $0x140] ss:$16 sps:$4 sm:$0xff]  }
  0x10   :  { %388 = vmatprep.subr.bf16.mxu0 %v593_v17  ;;  %441 = vmatprep.subr.bf16.mxu1 %v595_v18  ;;  %v71_v44 = vld [vmem:[%s908_s2] sm:$0xff]  ;;  %v634_v47 = vld [vmem:[%s906_s0 + $0x148] ss:$16 sps:$4 sm:$0xff]   ;;  %v637_v51 = vld [vmem:[%s906_s0 + $0x16c] ss:$16 sps:$4 sm:$0xff]  }
  0x11   :  { %562 = vmatprep.mubr.msk.bf16.mxu0 %vm373_vm0, %v649_v40  ;;  %564 = vmatprep.mubr.msk.bf16.mxu1 %vm373_vm0, %v649_v40  ;;  %v72_v48 = vld [vmem:[%s908_s2 + $0x8] sm:$0xff]  ;;  %v74_v49 = vld [vmem:[%s908_s2 + $0x18] sm:$0xff]  ;;  %v635_v50 = vld [vmem:[%s906_s0 + $0x164] ss:$16 sps:$4 sm:$0xff]  }
  0x12   :  { %77 = vperm.xlu0 %567, %v71_v44   ;;  %87 = vperm.xlu1 %568, %v73_v45   ;;  %v639_v52 = vld [vmem:[%s906_s0 + $0x160] ss:$16 sps:$4 sm:$0xff]   ;;  %v640_v53 = vld [vmem:[%s906_s0 + $0x168] ss:$16 sps:$4 sm:$0xff]   ;;  %v641_v54 = vld [vmem:[%s906_s0 + $0x184] ss:$16 sps:$4 sm:$0xff]  }
  0x13   :  { %389 = vmatpush1.bf16.msra.mxu0 %v597_v19  ;;  %442 = vmatpush1.bf16.msra.mxu1 %v598_v20  ;;  %v643_v55 = vld [vmem:[%s906_s0 + $0x18c] ss:$16 sps:$4 sm:$0xff]   ;;  %v645_v56 = vld [vmem:[%s906_s0 + $0x180] ss:$16 sps:$4 sm:$0xff]   ;;  %v646_v57 = vld [vmem:[%s906_s0 + $0x188] ss:$16 sps:$4 sm:$0xff]  }
  0x14   :  { %390 = vmatprep.subr.bf16.mxu0 %v599_v21  ;;  %443 = vmatprep.subr.bf16.mxu1 %v601_v22  ;;  %v647_v58 = vld [vmem:[%s907_s1] ss:$8 sps:$4 sm:$0xff]   ;;  %v650_v59 = vld [vmem:[%s907_s1 + $0x14] ss:$8 sps:$4 sm:$0xff]   ;;  %v652_v60 = vld [vmem:[%s907_s1 + $0x10] ss:$8 sps:$4 sm:$0xff]  }
  0x16   :  { %82 = vperm.xlu0 %567, %v72_v48   ;;  %92 = vperm.xlu1 %568, %v74_v49  }
  0x17   :  { %391 = vmatpush1.bf16.msra.mxu0 %v603_v23  ;;  %444 = vmatpush1.bf16.msra.mxu1 %v604_v24 }
  0x18   :  { %392 = vmatprep.subr.bf16.mxu0 %v605_v25  ;;  %445 = vmatprep.subr.bf16.mxu1 %v607_v26 }
  0x1b   :  { %393 = vmatpush1.bf16.msra.mxu0 %v609_v27  ;;  %446 = vmatpush1.bf16.msra.mxu1 %v610_v28 }
  0x1c   :  { %394 = vmatprep.subr.bf16.mxu0 %v611_v29  ;;  %447 = vmatprep.subr.bf16.mxu1 %v613_v30 }
  0x1f   :  { %395 = vmatpush1.bf16.msra.mxu0 %v615_v31  ;;  %448 = vmatpush1.bf16.msra.mxu1 %v616_v32 }
  0x20   :  { %396 = vmatprep.subr.bf16.mxu0 %v617_v33  ;;  %449 = vmatprep.subr.bf16.mxu1 %v619_v34 }
  0x23   :  { %397 = vmatpush1.bf16.msra.mxu0 %v621_v35  ;;  %450 = vmatpush1.bf16.msra.mxu1 %v622_v36 }
  0x24   :  { %398 = vmatprep.subr.bf16.mxu0 %v623_v37  ;;  %451 = vmatprep.subr.bf16.mxu1 %v625_v38 }
  0x27   :  { %399 = vmatpush1.bf16.msra.mxu0 %v627_v39  ;;  %452 = vmatpush1.bf16.msra.mxu1 %v628_v41 }
  0x28   :  { %400 = vmatprep.subr.bf16.mxu0 %v629_v42  ;;  %453 = vmatprep.subr.bf16.mxu1 %v631_v43 }
  0x2b   :  { %401 = vmatpush1.bf16.msra.mxu0 %v633_v46  ;;  %454 = vmatpush1.bf16.msra.mxu1 %v634_v47 }
  0x2c   :  { %402 = vmatprep.subr.bf16.mxu0 %v635_v50  ;;  %455 = vmatprep.subr.bf16.mxu1 %v637_v51 }
  0x2f   :  { %403 = vmatpush1.bf16.msra.mxu0 %v639_v52  ;;  %456 = vmatpush1.bf16.msra.mxu1 %v640_v53 }
  0x30   :  { %404 = vmatprep.subr.bf16.mxu0 %v641_v54  ;;  %457 = vmatprep.subr.bf16.mxu1 %v643_v55 }
  0x33   :  { %405 = vmatpush1.bf16.msra.mxu0 %v645_v56  ;;  %458 = vmatpush1.bf16.msra.mxu1 %v646_v57 }
  0x36   :  { %413 = vmatmul.mubr.bf16.vlgmr.msra.gmra.mrb[0].mxu0 %v647_v58  ;;  %466 = vmatmul.mubr.bf16.vlgmr.msra.gmra.mrb[0].mxu1 %v647_v58 }
  0x37   :  { %563 = vmatprep.mubr.msk.bf16.mxu0 %vm373_vm0, %v650_v59  ;;  %565 = vmatprep.mubr.msk.bf16.mxu1 %vm373_vm0, %v650_v59 }
  0x3e   :  { %423 = vmatmul.mubr.bf16.gmra.mrb[4].mxu0 %v652_v60  ;;  %476 = vmatmul.mubr.bf16.gmra.mrb[4].mxu1 %v652_v60 }
  0x91   :  { %v78_v61 = vpop.permute.xlu0 %77  ;;  %v88_v63 = vpop.permute.xlu1 %87 }
  0x95   :  { %v83_v62 = vpop.permute.xlu0 %82  ;;  %v93_v16 = vpop.permute.xlu1 %92 }
 0x109   :  { %v414_v0 = vpop.f32.mrb[0].mxu0  ;;  %v467_v1 = vpop.f32.mrb[0].mxu1 }
 0x10a   :  { %v415_v2 = vadd.f32 %v414_v0, %v78_v61  ;;  %v468_v3 = vadd.f32 %v467_v1, %v78_v61  ;;  %v416_v4 = vpop.f32.mrb[1].mxu0  ;;  %v469_v5 = vpop.f32.mrb[1].mxu1 }
 0x10b   :  { %v417_v6 = vadd.f32 %v416_v4, %v78_v61  ;;  %v470_v7 = vadd.f32 %v469_v5, %v78_v61  ;;  %v418_v8 = vpop.f32.mrb[2].mxu0  ;;  %v471_v9 = vpop.f32.mrb[2].mxu1 }
 0x10c   :  { %486 = vst [vmem:[%s909_s3] sm:$0xff] %v415_v2  ;;  %488 = vst [vmem:[%s909_s3 + $0x10] sm:$0xff] %v468_v3  ;;  %v419_v10 = vadd.f32 %v418_v8, %v83_v62  ;;  %v472_v11 = vadd.f32 %v471_v9, %v83_v62  ;;  %v420_v12 = vpop.f32.mrb[3].mxu0  ;;  %v473_v13 = vpop.f32.mrb[3].mxu1 }
 0x10d   :  { %487 = vst [vmem:[%s909_s3 + $0x8] sm:$0xff] %v417_v6  ;;  %489 = vst [vmem:[%s909_s3 + $0x18] sm:$0xff] %v470_v7  ;;  %v421_v14 = vadd.f32 %v420_v12, %v83_v62  ;;  %v474_v15 = vadd.f32 %v473_v13, %v83_v62 }
 0x10e   :  { %490 = vst [vmem:[%s909_s3 + $0x20] sm:$0xff] %v419_v10  ;;  %492 = vst [vmem:[%s909_s3 + $0x30] sm:$0xff] %v472_v11 }
 0x10f   :  { %491 = vst [vmem:[%s909_s3 + $0x28] sm:$0xff] %v421_v14  ;;  %493 = vst [vmem:[%s909_s3 + $0x38] sm:$0xff] %v474_v15 }
 0x111   :  { %v424_v17 = vpop.f32.mrb[4].mxu0  ;;  %v477_v18 = vpop.f32.mrb[4].mxu1 }
 0x112   :  { %v425_v19 = vadd.f32 %v424_v17, %v88_v63  ;;  %v478_v20 = vadd.f32 %v477_v18, %v88_v63  ;;  %v426_v21 = vpop.f32.mrb[5].mxu0  ;;  %v479_v22 = vpop.f32.mrb[5].mxu1 }
 0x113   :  { %v427_v23 = vadd.f32 %v426_v21, %v88_v63  ;;  %v480_v24 = vadd.f32 %v479_v22, %v88_v63  ;;  %v428_v25 = vpop.f32.mrb[6].mxu0  ;;  %v481_v26 = vpop.f32.mrb[6].mxu1 }
 0x114   :  { %494 = vst [vmem:[%s909_s3 + $0x40] sm:$0xff] %v425_v19  ;;  %496 = vst [vmem:[%s909_s3 + $0x50] sm:$0xff] %v478_v20  ;;  %v429_v27 = vadd.f32 %v428_v25, %v93_v16  ;;  %v482_v28 = vadd.f32 %v481_v26, %v93_v16  ;;  %v430_v29 = vpop.f32.mrb[7].mxu0  ;;  %v483_v30 = vpop.f32.mrb[7].mxu1 }
 0x115   :  { %495 = vst [vmem:[%s909_s3 + $0x48] sm:$0xff] %v427_v23  ;;  %497 = vst [vmem:[%s909_s3 + $0x58] sm:$0xff] %v480_v24  ;;  %v431_v31 = vadd.f32 %v430_v29, %v93_v16  ;;  %v484_v32 = vadd.f32 %v483_v30, %v93_v16 }
 0x116   :  { %498 = vst [vmem:[%s909_s3 + $0x60] sm:$0xff] %v429_v27  ;;  %500 = vst [vmem:[%s909_s3 + $0x70] sm:$0xff] %v482_v28 }
 0x117   :  { %499 = vst [vmem:[%s909_s3 + $0x68] sm:$0xff] %v431_v31  ;;  %501 = vst [vmem:[%s909_s3 + $0x78] sm:$0xff] %v484_v32 }

</bundles_post_ra>
